<compile_context>
chip_gen: v7x
topology: tpu7x:2x2x1
jax: 0.10.0
libtpu: 0.0.40
codegen_flags: <defaults>
</compile_context>

<pallas_src>
import jax
import jax.numpy as jnp
from jax.experimental import pallas as pl
from jax.experimental.pallas import tpu as pltpu


# ---------------- kernels ----------------

def _add_row_bias_kernel(x_ref, b_ref, o_ref):
    # x: (tm, tn); b: (1, tn) -> sublane-broadcast add on the VPU.
    o_ref[...] = (x_ref[...] + b_ref[...]).astype(o_ref.dtype)


def _add_col_bias_kernel(x_ref, b_ref, o_ref):
    # x: (tm, tn); b: (tm, 1) -> lane-broadcast add on the VPU.
    o_ref[...] = (x_ref[...] + b_ref[...]).astype(o_ref.dtype)


# ---------------- tiling helpers ----------------

def _cdiv(a, b):
    return -(-a // b)


def _round_up(a, b):
    return _cdiv(a, b) * b


def _sublane_align(*dtypes):
    """Dtype-aware sublane alignment: 8 for 4B, 16 for 2B, 32 for 1B types."""
    min_bytes = min(jnp.dtype(d).itemsize for d in dtypes)
    return max(8, 32 // max(min_bytes, 1))


def _pick_tiles(R, L, row_align):
    """Largest legal tiles <= (512, 1024); then ensure >=2 grid blocks when
    possible so v7x's 2 TensorCores both get work."""
    tm = R if R <= 512 else (512 // row_align) * row_align
    tn = L if L <= 1024 else 1024
    if _cdiv(R, tm) * _cdiv(L, tn) == 1:
        if R >= 2 * row_align:
            tm = _round_up(_cdiv(R, 2), row_align)
        elif L >= 256:
            tn = _round_up(_cdiv(L, 2), 128)
    return tm, tn


def _vmem_limit_bytes(tm, tn, bias_len, xo_dtypes, bias_dtype):
    # double-buffered x-in + out tiles, plus the (tiny) bias tile + headroom.
    live = 0
    for d in xo_dtypes:
        live += 2 * tm * tn * jnp.dtype(d).itemsize
    live += 2 * bias_len * jnp.dtype(bias_dtype).itemsize
    # never below any chip's default scoped limit, never near v7x's 64 MiB.
    return int(min(max(live + (4 << 20), 32 << 20), 48 << 20))


# ---------------- pallas_call wrappers ----------------

def _tiled_row_bias_add(x2d, bias_row, out_dtype):
    """x2d: (R, L); bias_row: (1, L), broadcast over rows."""
    R, L = x2d.shape
    align = _sublane_align(x2d.dtype, out_dtype)
    tm, tn = _pick_tiles(R, L, align)
    # Row axis is the FAST (innermost) grid axis; bias block (0, j) only
    # depends on the slow axis j, so its DMA is not re-issued every step.
    grid = (_cdiv(L, tn), _cdiv(R, tm))
    return pl.pallas_call(
        _add_row_bias_kernel,
        out_shape=jax.ShapeDtypeStruct((R, L), out_dtype),
        grid=grid,
        in_specs=[
            pl.BlockSpec((tm, tn), lambda j, i: (i, j)),
            pl.BlockSpec((1, tn), lambda j, i: (0, j)),
        ],
        out_specs=pl.BlockSpec((tm, tn), lambda j, i: (i, j)),
        compiler_params=pltpu.CompilerParams(
            dimension_semantics=("parallel", "parallel"),
            vmem_limit_bytes=_vmem_limit_bytes(
                tm, tn, tn, (x2d.dtype, out_dtype), bias_row.dtype)),
    )(x2d, bias_row)


def _tiled_col_bias_add(x2d, bias_col, out_dtype):
    """x2d: (R, L); bias_col: (R, 1), broadcast over lanes."""
    R, L = x2d.shape
    align = _sublane_align(x2d.dtype, out_dtype, bias_col.dtype)
    tm, tn = _pick_tiles(R, L, align)
    # Lane axis is the FAST grid axis; bias block (i, 0) only depends on the
    # slow axis i, so it stays resident across consecutive steps.
    grid = (_cdiv(R, tm), _cdiv(L, tn))
    return pl.pallas_call(
        _add_col_bias_kernel,
        out_shape=jax.ShapeDtypeStruct((R, L), out_dtype),
        grid=grid,
        in_specs=[
            pl.BlockSpec((tm, tn), lambda i, j: (i, j)),
            pl.BlockSpec((tm, 1), lambda i, j: (i, 0)),
        ],
        out_specs=pl.BlockSpec((tm, tn), lambda i, j: (i, j)),
        compiler_params=pltpu.CompilerParams(
            dimension_semantics=("parallel", "parallel"),
            vmem_limit_bytes=_vmem_limit_bytes(
                tm, tn, tm, (x2d.dtype, out_dtype), bias_col.dtype)),
    )(x2d, bias_col)


# ---------------- wrapper (module forward) ----------------

def add_bias(x, bias_param):
    """bias_param has shape (C, 1), mirroring nn.Parameter(bias.unsqueeze(1))."""
    out_dtype = jnp.result_type(x.dtype, bias_param.dtype)
    if x.ndim == 2:
        N, C = x.shape
        bias_flat = bias_param.reshape(C)
        # Lane-dense repack when C < 128: fold k consecutive batch rows into
        # one lane-dense row (avoids masked vst.msk partial stores).
        k = _cdiv(128, C)
        if C < 128 and k > 1 and N >= k and N % k == 0:
            x2d = x.reshape(N // k, k * C)
            bias_row = jnp.tile(bias_flat, k).reshape(1, k * C)
            out = _tiled_row_bias_add(x2d, bias_row, out_dtype)
            return out.reshape(N, C)
        bias_row = bias_flat.reshape(1, C)
        return _tiled_row_bias_add(x, bias_row, out_dtype)
    elif x.ndim == 4:
        N, C, H, W = x.shape
        hw = H * W
        if N < 8 and hw >= 128:
            # Sublane-dense fold: (N*C, H*W) rows + per-row bias column.
            x2d = x.reshape(N * C, hw)
            bias_col = jnp.tile(bias_param, (N, 1))          # (N*C, 1)
            out = _tiled_col_bias_add(x2d, bias_col, out_dtype)
            return out.reshape(N, C, H, W)
        # Lane-dense fold: (N, C*H*W) + per-channel row bias expanded over hw.
        x2d = x.reshape(N, C * hw)
        bias_row = jnp.broadcast_to(bias_param, (C, hw)).reshape(1, C * hw)
        out = _tiled_row_bias_add(x2d, bias_row, out_dtype)
        return out.reshape(N, C, H, W)
    else:
        raise ValueError(f"AddBias expects 2D or 4D input, got {x.ndim}D")


# ---------------- demo / check ----------------

if __name__ == "__main__":
    key = jax.random.PRNGKey(0)
    k1, k2, k3, k4 = jax.random.split(key, 4)

    # --- 4D (conv) case: x (N=2, C=4, H=16, W=16), bias param (4, 1) ---
    # N < 8 -> sublane-dense (N*C, H*W) fold with column bias.
    x4 = jax.random.normal(k1, (2, 4, 16, 16), dtype=jnp.float32)
    bias4 = jax.random.normal(k2, (4,), dtype=jnp.float32)[:, None]  # unsqueeze(1)
    out4 = add_bias(x4, bias4)
    jax.block_until_ready(out4)
    ref4 = x4 + bias4.T.reshape(1, -1, 1, 1)
    assert out4.shape == ref4.shape
    assert jnp.allclose(out4, ref4, atol=1e-6), "4D AddBias mismatch"

    # --- 2D (linear) case: x (N=2, C=32), bias param (32, 1) ---
    # N % ceil(128/C) != 0 -> fallback (no repack).
    x2 = jax.random.normal(k3, (2, 32), dtype=jnp.float32)
    bias2 = jax.random.normal(k4, (32,), dtype=jnp.float32)[:, None]
    out2 = add_bias(x2, bias2)
    jax.block_until_ready(out2)
    ref2 = x2 + bias2.T.reshape(1, -1)
    assert out2.shape == ref2.shape
    assert jnp.allclose(out2, ref2, atol=1e-6), "2D AddBias mismatch"

    # --- 2D case exercising the lane-dense repack (N=8, C=32 -> k=4) ---
    x2b = jax.random.normal(k1, (8, 32), dtype=jnp.float32)
    out2b = add_bias(x2b, bias2)
    jax.block_until_ready(out2b)
    ref2b = x2b + bias2.T.reshape(1, -1)
    assert jnp.allclose(out2b, ref2b, atol=1e-6), "2D repacked AddBias mismatch"

    # --- larger 4D case (N>=8 -> lane-dense (N, C*H*W) fold, multi-block grid) ---
    xL = jax.random.normal(k1, (16, 32, 32, 32), dtype=jnp.float32)  # L = 32768
    biasL = jax.random.normal(k2, (32,), dtype=jnp.float32)[:, None]
    outL = add_bias(xL, biasL)
    jax.block_until_ready(outL)
    refL = xL + biasL.T.reshape(1, -1, 1, 1)
    assert jnp.allclose(outL, refL, atol=1e-6), "large 4D AddBias mismatch"

    # --- non-divisible shape (tail blocks on both grid axes) ---
    xT = jax.random.normal(k3, (520, 1150), dtype=jnp.float32)
    biasT = jax.random.normal(k4, (1150,), dtype=jnp.float32)[:, None]
    outT = add_bias(xT, biasT)
    jax.block_until_ready(outT)
    refT = xT + biasT.T.reshape(1, -1)
    assert jnp.allclose(outT, refT, atol=1e-6), "tail-block AddBias mismatch"

    # --- bf16 4D case, odd N*C rows (dtype-aware path, col-bias fold) ---
    xB = jax.random.normal(k1, (3, 5, 16, 16), dtype=jnp.bfloat16)
    biasB = jax.random.normal(k2, (5,), dtype=jnp.bfloat16)[:, None]
    outB = add_bias(xB, biasB)
    jax.block_until_ready(outB)
    refB = xB + biasB.T.reshape(1, -1, 1, 1)
    assert outB.dtype == refB.dtype
    assert jnp.allclose(outB.astype(jnp.float32), refB.astype(jnp.float32),
                        atol=1e-2), "bf16 4D AddBias mismatch"

    print("KERNEL_OK")
</pallas_src>

<mosaic_0001>
module attributes {stable_mosaic.version = 11 : i64} {
  func.func @_add_col_bias_kernel(%arg0: i32, %arg1: i32, %arg2: memref<8x128xf32, #tpu.memory_space<vmem>>, %arg3: memref<8x1xf32, #tpu.memory_space<vmem>>, %arg4: memref<8x128xf32, #tpu.memory_space<vmem>>) attributes {dimension_semantics = [#tpu.dimension_semantics<parallel>, #tpu.dimension_semantics<parallel>], iteration_bounds = array<i64: 1, 2>, scalar_prefetch = 0 : i64, scratch_operands = 0 : i64, tpu.core_type = #tpu.core_type<tc>, window_params = [{transform_indices = @transform_0, window_bounds = array<i64: 8, 128>}, {transform_indices = @transform_1, window_bounds = array<i64: 8, 1>}, {transform_indices = @transform_2, window_bounds = array<i64: 8, 128>}]} {
    %c0 = arith.constant 0 : index
    %c0_0 = arith.constant 0 : index
    %0 = vector.load %arg2[%c0, %c0_0] : memref<8x128xf32, #tpu.memory_space<vmem>>, vector<8x128xf32>
    %c0_1 = arith.constant 0 : index
    %c0_2 = arith.constant 0 : index
    %1 = vector.load %arg3[%c0_1, %c0_2] : memref<8x1xf32, #tpu.memory_space<vmem>>, vector<8x1xf32>
    %2 = vector.broadcast %1 : vector<8x1xf32> to vector<8x128xf32>
    %3 = arith.addf %0, %2 : vector<8x128xf32>
    %c0_3 = arith.constant 0 : index
    %c0_4 = arith.constant 0 : index
    %4 = vector.load %arg4[%c0_3, %c0_4] : memref<8x128xf32, #tpu.memory_space<vmem>>, vector<8x128xf32>
    tpu.vector_store %arg4[%c0_3, %c0_4], %3 {strides = array<i32>} : memref<8x128xf32, #tpu.memory_space<vmem>>, vector<8x128xf32>,
    return
  }
  func.func @transform_0(%arg0: i32, %arg1: i32) -> (i32, i32) {
    %c0_i32 = arith.constant 0 : i32
    return %arg0, %arg1 : i32, i32
  }
  func.func @transform_1(%arg0: i32, %arg1: i32) -> (i32, i32) {
    %c0_i32 = arith.constant 0 : i32
    %c0_i32_0 = arith.constant 0 : i32
    return %arg0, %c0_i32 : i32, i32
  }
  func.func @transform_2(%arg0: i32, %arg1: i32) -> (i32, i32) {
    %c0_i32 = arith.constant 0 : i32
    return %arg0, %arg1 : i32, i32
  }
}

</mosaic_0001>

<bundles_post_ra>
// kernel: tpu_custom_call.1
= control target key start
LH: loop header
LB: loop body
LE: loop exit
PB: predicated region body
PF: predicated region fallthrough
CT: control target
= control target key end

     0   :  { %7 = vsyncpa [#allocation3], 0  ;;  %s701_s0 = inlined_call_operand.hbm [shape: f32[8,256], index: 0, kind: input, shape index: {}]   ;;  %s702_s1 = inlined_call_operand.vmem [shape: f32[8,1], index: 1, kind: input, shape index: {}]   ;;  %s703_s2 = inlined_call_operand.hbm [shape: f32[8,256], index: 2, kind: output, shape index: {}]  }
   0x1   :  { %9 = vsyncpa [#allocation3 + $0x1], 0 }
   0x2   :  { %10 = vsyncpa [#allocation4], 0 }
   0x3   :  { %12 = vsyncpa [#allocation4 + $0x1], 0  ;;  %s526_s9 = smov 0   ;;  %s528_s10 = smov 0  }
   0x4   :  { %s530_s11 = smov 0   ;;  %s532_s12 = smov 0  }
   0x5   :  { %s534_s13 = smov 0   ;;  %s536_s14 = smov 0  }
   0x6 LB: > { %s316_s15 = sadd.s32 4294967295, %s506_s14   ;;  %s317_s16 = sadd.s32 4294967294, %s506_s14   ;;  %s506_s14 = sphi %s536_s14, %s18_s14   ;;  %s502_s13 = sphi %s534_s13, %s719_s13   ;;  %s498_s12 = sphi %s532_s12, %s718_s12   ;;  %s494_s11 = sphi %s530_s11, %s717_s11   ;;  %s490_s10 = sphi %s528_s10, %s716_s10   ;;  %s486_s9 = sphi %s526_s9, %s715_s9  }
   0x7   : > { %s27_s17 = sadd.s32 1, %s502_s13  ;;  %s39_s18 = sadd.s32 1, %s494_s11 }
   0x8   : > { %p28_p0 = scmp.ge.s32.totalorder %s27_s17, 2  ;;  %p46_p1 = scmp.ne.s32.totalorder %s494_s11, %s490_s10 }
   0x9   : > { %p47_p2 = scmp.eq.s32.totalorder %s506_s14, 0  ;;  %p52_p3 = scmp.ne.s32.totalorder %s490_s10, %s486_s9 }
   0xa   : > { %s721_s17 = smov (%p28_p0, %s27_s17), 0  ;;  %p53_p5 = scmp.eq.s32.totalorder %s316_s15, 0 }
   0xb   : > { %p567_p4 = por %p47_p2, %p46_p1  ;;  %s35_s20 = ssub.s32 %s502_s13, %s721_s17 }
   0xc   : > { %p104_p6 = scmp.eq.s32.totalorder %s316_s15, 1  ;;  %p37_p7 = scmp.eq.s32.totalorder %s35_s20, 0 }
   0xd   : > { %p573_p8 = por %p53_p5, %p52_p3  ;;  %p110_p10 = scmp.eq.s32.totalorder %s317_s16, 1 }
   0xe   : > { %p577_p9 = por %p104_p6, %p46_p1  ;;  %p342_p13 = scmp.lt.s32.totalorder %s506_s14, 2 }
   0xf   : > { %s582_s23 = scalar_select %p37_p7, %s494_s11, %s39_s18  }
  0x10   : > { %s707_s22 = scalar_select %p577_p9, 1, 0 }
  0x11   : > { %p584_p11 = por %p110_p10, %p52_p3  ;;  %s137_s25 = sand.u32 1, %s494_s11  }
  0x12   : > { %s321_s26 = sshll.u32 %s137_s25, 3  ;;  %s322_s27 = sshll.u32 %s502_s13, 7 }
  0x13   : > { %s708_s24 = scalar_select %p584_p11, 1, 0 }
  0x14   : > { %s595_s30 = scalar_lea.hbm %s701_s0, %s322_s27  ;;  %s141_s3 = scalar_lea.vmem [#allocation2], %s321_s26 }
  0x15   : > { %s150_s4 = sshll.u32 %s141_s3, 4  ;;  %p601_p0 = pnand %p342_p13, %p567_p4  ;;  %s597_s4 = int_to_ptr.vmem [resolvable:$true] %s150_s4 }
  0x16   : > { %s138_s6 = scalar_lea.sflag [#allocation3], %s137_s25  ;;  %s394_s7 = scalar_lea.hbm %s595_s30, 128 }
  0x17   : > { %p395_p3 = scmp.ne.s32.totalorder %s595_s30, %s394_s7  ;;  %p396_p5 = pneg %p601_p0 }
  0x18   : > { %s399_s16 = scalar_lea.hbm %s701_s0, 256  ;;  %p400_p4 = scmp.lt.u32.totalorder %s595_s30, %s701_s0 }
  0x19   : > { %p397_p6 = pnand %p396_p5, %p395_p3  ;;  %p401_p10 = scmp.lt.u32.totalorder %s399_s16, %s394_s7 }
  0x1a   : > { %p403_p12 = scmp.lt.u32.totalorder %s394_s7, %s595_s30 }
  0x1b   : > { %p398_p7 = pneg %p397_p6  ;;  %p402_p13 = por %p401_p10, %p400_p4 }
  0x1d   : > { %p404_p1 = por %p403_p12, %p402_p13 }
  0x1f   : > { %p405_p2 = pnand %p404_p1, %p398_p7 }
  0x21   : > { %408 = shalt.err (!%p405_p2)
}
  0x22   : > { %s409_s20 = scalar_lea.vmem %s597_s4, 128  ;;  %s508_s25 = smov [#allocation2]  }
  0x23   : > { %p410_p3 = scmp.ne.s32.totalorder %s597_s4, %s409_s20  ;;  %s414_s26 = sshll.u32 %s508_s25, 4  ;;  %s415_s26 = int_to_ptr.vmem [resolvable:$false] %s414_s26 }
  0x24   : > { %s416_s27 = scalar_lea.vmem %s415_s26, 256  ;;  %p417_p9 = scmp.lt.s32.totalorder %s597_s4, %s415_s26 }
  0x25   : > { %p412_p6 = pnand %p410_p3, %p396_p5  ;;  %p418_p4 = scmp.lt.s32.totalorder %s416_s27, %s409_s20 }
  0x27   : > { %p413_p11 = pneg %p412_p6  ;;  %p419_p10 = por %p418_p4, %p417_p9 }
  0x29   : > { %p420_p12 = pnand %p419_p10, %p413_p11 }
  0x2b   : > { %423 = shalt.err (!%p420_p12)
}
  0x2c   : > { %337 = dma.hbm_to_vmem [thread:$0]  (!%p601_p0), %s595_s30, 128, %s597_s4, %s138_s6  }
  0x2d   : > { %p710_p1 = scmp.lt.s32.totalorder %s506_s14, 3  ;;  %p711_p2 = scmp.ge.s32.totalorder %s506_s14, 1 }
  0x2f   : > { %p156_p5 = pnand %p711_p2, %p710_p1 }
  0x30   : > { %s637_s28 = sand.u32 (!%p156_p5), 1, %s490_s10  }
  0x31   : > { %159 = sbr.rel (%p156_p5) target bundleno = 203 (0xcb), region = 28  ;;  %s324_s29 = sshll.u32 (!%p156_p5), %s637_s28, 3 }
  0x32   : > { %s162_s3 = scalar_lea.sflag (!%p156_p5), [#allocation3], %s637_s28  ;;  %s165_s7 = scalar_lea.vmem (!%p156_p5), [#allocation2], %s324_s29 }
  0x38   : > { %477 = dma.done.wait (%p573_p8), %s162_s3, 128  }
  0x39   : > { %479 = vsyncadd (%p573_p8), %s162_s3, 4294967168  ;;  %v509_v0 = vmov 0   ;;  %v195_v1 = vld [vmem:[%s702_s1] sm:$0xff]  ;;  %s327_s5 = sshll.u32 %s498_s12, 7  ;;  %s189_s6 = scalar_lea.vmem [#allocation5], %s324_s29 }
  0x3a   : > { %393 = vset.pattern.permute.xlu0 %v509_v0  ;;  %v194_v2 = vld [vmem:[%s165_s7] sm:$0xff]  ;;  %s219_s8 = sshll.u32 %s189_s6, 4  ;;  %s652_s21 = scalar_lea.hbm %s703_s2, %s327_s5  ;;  %s654_s8 = int_to_ptr.vmem [resolvable:$true] %s219_s8 }
  0x3b   : > { %198 = vperm.xlu0 %393, %v195_v1   ;;  %s204_s18 = scalar_lea.sflag [#allocation4], %s637_s28  ;;  %s424_s19 = scalar_lea.vmem %s654_s8, 128 }
  0x3c   : > { %p425_p8 = scmp.ne.s32.totalorder %s654_s8, %s424_s19  ;;  %p712_p9 = scmp.ne.s32.totalorder %s707_s22, 0 }
  0x3d   : > { %s510_s12 = smov [#allocation5]  }
  0x3e   : > { %p426_p11 = pnand %p425_p8, %p712_p9  ;;  %s428_s20 = sshll.u32 %s510_s12, 4  ;;  %s429_s20 = int_to_ptr.vmem [resolvable:$false] %s428_s20 }
  0x3f   : > { %s430_s25 = scalar_lea.vmem %s429_s20, 256  ;;  %p431_p7 = scmp.lt.s32.totalorder %s654_s8, %s429_s20 }
  0x40   : > { %p427_p0 = pneg %p426_p11  ;;  %p432_p13 = scmp.lt.s32.totalorder %s430_s25, %s424_s19 }
  0x42   : > { %p433_p3 = por %p432_p13, %p431_p7 }
  0x44   : > { %p434_p6 = pnand %p433_p3, %p427_p0 }
  0xba   : > { %v199_v3 = vpop.permute.xlu0 %198 }
  0xbb   : > { %v201_v4 = vadd.f32 %v199_v3, %v194_v2 }
  0xbd   : > { %202 = vst [vmem:[%s189_s6] sm:$0xff] %v201_v4 }
  0xbe   : > { %437 = shalt.err (!%p434_p6)
}
  0xbf   : > { %s438_s26 = scalar_lea.hbm %s652_s21, 128  ;;  %s442_s29 = scalar_lea.hbm %s703_s2, 256 }
  0xc0   : > { %p439_p4 = scmp.ne.s32.totalorder %s652_s21, %s438_s26  ;;  %p443_p1 = scmp.lt.u32.totalorder %s652_s21, %s703_s2 }
  0xc1   : > { %p444_p2 = scmp.lt.u32.totalorder %s442_s29, %s438_s26  ;;  %p446_p8 = scmp.lt.u32.totalorder %s438_s26, %s652_s21 }
  0xc2   : > { %p440_p10 = pnand %p439_p4, %p712_p9 }
  0xc3   : > { %p445_p5 = por %p444_p2, %p443_p1 }
  0xc4   : > { %p441_p12 = pneg %p440_p10 }
  0xc5   : > { %p447_p11 = por %p446_p8, %p445_p5 }
  0xc7   : > { %p448_p0 = pnand %p447_p11, %p441_p12 }
  0xc9   : > { %451 = shalt.err (!%p448_p0)
}
  0xca   : > { %332 = dma.vmem_to_hbm [thread:$0]  (%p712_p9), %s654_s8, 128, %s652_s21, %s204_s18  }
  0xcb PF: > { %s231_s30 = sand.u32 1, %s486_s9   ;;  %p713_p7 = scmp.ne.s32.totalorder %s708_s24, 0 }
  0xcc   : > { %p714_p13 = scmp.ge.s32.totalorder %s506_s14, 2  ;;  %s232_s4 = scalar_lea.sflag [#allocation4], %s231_s30 }
  0xce   : > { %p339_p3 = pnand %p714_p13, %p713_p7 }
  0xd0   : > { %481 = dma.done.wait (!%p339_p3), %s232_s4, 128  }
  0xd1   : > { %483 = vsyncadd (!%p339_p3), %s232_s4, 4294967168  ;;  %s18_s14 = sadd.s32 1, %s506_s14   ;;  %s715_s9 = smov %s490_s10 }
  0xd2   : > { %p15_p6 = scmp.ge.s32.totalorder %s18_s14, 4   ;;  %s716_s10 = smov %s494_s11 }
  0xd3   : > { %s717_s11 = smov %s582_s23  ;;  %s718_s12 = smov %s502_s13 }
  0xd4   : > { %s719_s13 = smov %s721_s17  ;;  %17 = sbr.rel (!%p15_p6) target bundleno = 6 (0x6), region = 76 }
  0xdb   :  { %237 = vsyncpa [#allocation3], 1 }
  0xdc   :  { %239 = vsyncpa [#allocation3 + $0x1], 1 }
  0xdd   :  { %240 = vsyncpa [#allocation4], 1 }
  0xde   :  { %242 = vsyncpa [#allocation4 + $0x1], 1 }

</bundles_post_ra>
